<compile_context>
chip_gen: v5e
topology: v5e:2x2
jax: 0.10.0
libtpu: 0.0.40
codegen_flags: <defaults>
</compile_context>

<pallas_src>
import jax
import jax.numpy as jnp
from jax.experimental import pallas as pl
from jax.experimental.pallas import tpu as pltpu


def _soft_threshold_kernel(x_ref, t_ref, o_ref):
    # x_ref: (tile_r, L) lane-dense tile of the flattened (B*C, H*W) input.
    # t_ref: (tile_r, 1) per-row (== per-channel) threshold column.
    x = x_ref[...]
    t = t_ref[...]                       # broadcasts along the lane dim
    zero = jnp.zeros((), dtype=x.dtype)
    # Exactly mask1*(x-t) + mask2*(x+t) from the PyTorch module (both branches
    # summed, so even a negative learned threshold reproduces the original 2x
    # behavior), but without bool->f32 casts and multiplies.
    o_ref[...] = jnp.where(x > t, x - t, zero) + jnp.where(x < -t, x + t, zero)


def soft_threshold(x, threshold, *, max_tile_bytes=2 * 1024 * 1024):
    """Per-channel soft thresholding.

    x:         (B, C, H, W)
    threshold: (1, C, 1, 1)  (matches the PyTorch nn.Parameter layout)
    """
    B, C, H, W = x.shape
    R = B * C            # fused batch*channel rows
    L = H * W            # flattened, lane-dense spatial dim

    # Lane-dense 2-D views (wrapper-side layout plumbing only).
    x2 = x.reshape(R, L)
    # Per-row threshold column: row r = b*C + c  ->  threshold[c].
    t_col = jnp.broadcast_to(threshold.reshape(1, C), (B, C)).reshape(R, 1)

    # Largest row tile that keeps one buffer under max_tile_bytes.  With
    # double-buffered in + out this stays well inside even v5e's 16 MiB
    # scoped-VMEM default and v7x's 64 MiB physical VMEM.
    bytes_per_row = L * x2.dtype.itemsize
    rows_budget = max(1, max_tile_bytes // max(1, bytes_per_row))
    if rows_budget >= R:
        tile_r = R                                   # full extent: always legal
    else:
        tile_r = max(8, (rows_budget // 8) * 8)      # keep sublane multiple of 8

    grid = (pl.cdiv(R, tile_r),)

    out2 = pl.pallas_call(
        _soft_threshold_kernel,
        out_shape=jax.ShapeDtypeStruct((R, L), x2.dtype),
        grid_spec=pl.GridSpec(
            grid=grid,
            in_specs=[
                pl.BlockSpec((tile_r, L), lambda i: (i, 0)),
                pl.BlockSpec((tile_r, 1), lambda i: (i, 0)),
            ],
            out_specs=pl.BlockSpec((tile_r, L), lambda i: (i, 0)),
        ),
        compiler_params=pltpu.CompilerParams(
            dimension_semantics=("parallel",),
        ),
    )(x2, t_col)

    return out2.reshape(B, C, H, W)


def _reference(x, threshold):
    # Pure-JAX reference using the original PyTorch formulation.
    mask1 = (x > threshold).astype(x.dtype)
    mask2 = (x < -threshold).astype(x.dtype)
    return mask1 * (x - threshold) + mask2 * (x + threshold)


if __name__ == "__main__":
    B, C, H, W = 2, 4, 16, 16
    init_threshold = 0.001

    key = jax.random.PRNGKey(0)
    # Scale so a meaningful fraction of values falls inside the dead zone.
    x = jax.random.normal(key, (B, C, H, W), dtype=jnp.float32) * 0.002

    # (a) module-style init: init_threshold * ones(1, C, 1, 1)
    t_const = init_threshold * jnp.ones((1, C, 1, 1), dtype=jnp.float32)
    # (b) deterministic per-channel variation to exercise the broadcast path.
    t_varied = (init_threshold
                * (1.0 + jnp.arange(C, dtype=jnp.float32))).reshape(1, C, 1, 1)

    for t in (t_const, t_varied):
        out = jax.block_until_ready(soft_threshold(x, t))
        ref = _reference(x, t)
        assert out.shape == x.shape
        assert jnp.allclose(out, ref, atol=1e-6), "mismatch vs reference"

    print("KERNEL_OK")
</pallas_src>

<mosaic_0001>
module attributes {stable_mosaic.version = 11 : i64} {
  func.func @_soft_threshold_kernel(%arg0: i32, %arg1: memref<8x256xf32, #tpu.memory_space<vmem>>, %arg2: memref<8x1xf32, #tpu.memory_space<vmem>>, %arg3: memref<8x256xf32, #tpu.memory_space<vmem>>) attributes {dimension_semantics = [#tpu.dimension_semantics<parallel>], iteration_bounds = array<i64: 1>, scalar_prefetch = 0 : i64, scratch_operands = 0 : i64, tpu.core_type = #tpu.core_type<tc>, window_params = [{transform_indices = @transform_0, window_bounds = array<i64: 8, 256>}, {transform_indices = @transform_1, window_bounds = array<i64: 8, 1>}, {transform_indices = @transform_2, window_bounds = array<i64: 8, 256>}]} {
    %c0 = arith.constant 0 : index
    %c0_0 = arith.constant 0 : index
    %0 = vector.load %arg1[%c0, %c0_0] : memref<8x256xf32, #tpu.memory_space<vmem>>, vector<8x256xf32>
    %c0_1 = arith.constant 0 : index
    %c0_2 = arith.constant 0 : index
    %1 = vector.load %arg2[%c0_1, %c0_2] : memref<8x1xf32, #tpu.memory_space<vmem>>, vector<8x1xf32>
    %2 = vector.broadcast %1 : vector<8x1xf32> to vector<8x256xf32>
    %3 = arith.cmpf ogt, %0, %2 : vector<8x256xf32>
    %4 = vector.broadcast %1 : vector<8x1xf32> to vector<8x256xf32>
    %5 = arith.subf %0, %4 : vector<8x256xf32>
    %cst = arith.constant 0.000000e+00 : f32
    %6 = vector.broadcast %cst : f32 to vector<8x256xf32>
    %7 = arith.select %3, %5, %6 : vector<8x256xi1>, vector<8x256xf32>
    %cst_3 = arith.constant 0.000000e+00 : f32
    %8 = vector.broadcast %cst_3 : f32 to vector<8x1xf32>
    %9 = arith.subf %8, %1 : vector<8x1xf32>
    %10 = vector.broadcast %9 : vector<8x1xf32> to vector<8x256xf32>
    %11 = arith.cmpf olt, %0, %10 : vector<8x256xf32>
    %12 = vector.broadcast %1 : vector<8x1xf32> to vector<8x256xf32>
    %13 = arith.addf %0, %12 : vector<8x256xf32>
    %cst_4 = arith.constant 0.000000e+00 : f32
    %14 = vector.broadcast %cst_4 : f32 to vector<8x256xf32>
    %15 = arith.select %11, %13, %14 : vector<8x256xi1>, vector<8x256xf32>
    %16 = arith.addf %7, %15 : vector<8x256xf32>
    %c0_5 = arith.constant 0 : index
    %c0_6 = arith.constant 0 : index
    %17 = vector.load %arg3[%c0_5, %c0_6] : memref<8x256xf32, #tpu.memory_space<vmem>>, vector<8x256xf32>
    tpu.vector_store %arg3[%c0_5, %c0_6], %16 {strides = array<i32>} : memref<8x256xf32, #tpu.memory_space<vmem>>, vector<8x256xf32>,
    return
  }
  func.func @transform_0(%arg0: i32) -> (i32, i32) {
    %c0_i32 = arith.constant 0 : i32
    %c0_i32_0 = arith.constant 0 : i32
    return %arg0, %c0_i32 : i32, i32
  }
  func.func @transform_1(%arg0: i32) -> (i32, i32) {
    %c0_i32 = arith.constant 0 : i32
    %c0_i32_0 = arith.constant 0 : i32
    return %arg0, %c0_i32 : i32, i32
  }
  func.func @transform_2(%arg0: i32) -> (i32, i32) {
    %c0_i32 = arith.constant 0 : i32
    %c0_i32_0 = arith.constant 0 : i32
    return %arg0, %c0_i32 : i32, i32
  }
}

</mosaic_0001>

<bundles_post_ra>
// kernel: tpu_custom_call.1
= control target key start
LH: loop header
LB: loop body
LE: loop exit
PB: predicated region body
PF: predicated region fallthrough
CT: control target
= control target key end

     0   :  { %7 = vsyncpa [#allocation3], 0  ;;  %s156_s0 = inlined_call_operand.hbm [shape: f32[8,256], index: 0, kind: input, shape index: {}]   ;;  %s157_s1 = inlined_call_operand.vmem [shape: f32[8,1], index: 1, kind: input, shape index: {}]   ;;  %s158_s2 = inlined_call_operand.hbm [shape: f32[8,256], index: 2, kind: output, shape index: {}]  }
   0x1   :  { %8 = vsyncpa [#allocation4], 0  ;;  %s14_s11 = sshll.u32 %s156_s0, 4  ;;  %s129_s12 = smov [#allocation2]   ;;  %s15_s11 = int_to_ptr.hbm [resolvable:$true] %s14_s11 }
   0x2   :  { %s16_s13 = sshll.u32 %s129_s12, 4  ;;  %s17_s13 = int_to_ptr.vmem [resolvable:$true] %s16_s13 }
   0x3   :  { %19 = dma.hbm_to_vmem [thread:$0]  %s15_s11, 256, %s17_s13, [#allocation3]  }
   0x4   :  { %125 = dma.done.wait [#allocation3], 256  }
   0x5   :  { %126 = vsyncadd [#allocation3], 4294967040  ;;  %v130_v0 = vmov 0   ;;  %v28_v1 = vld [vmem:[%s157_s1] sm:$0xff]  ;;  %v27_v5 = vld [vmem:[#allocation2 + $0x8] sm:$0xff]  ;;  %s131_s0 = smov [#allocation5]  }
   0x6   :  { %76 = vset.pattern.permute.xlu0 %v130_v0  ;;  %v40_v2 = vsub.f32 0.0, %v28_v1  ;;  %v26_v4 = vld [vmem:[#allocation2] sm:$0xff]  ;;  %s61_s16 = sshll.u32 %s131_s0, 4  ;;  %s63_s1 = sshll.u32 %s158_s2, 4  ;;  %s62_s16 = int_to_ptr.vmem [resolvable:$true] %s61_s16  ;;  %s64_s1 = int_to_ptr.hbm [resolvable:$true] %s63_s1 }
   0x7   :  { %31 = vperm.xlu0 %76, %v28_v1  }
   0xf   :  { %43 = vperm.xlu0 %76, %v40_v2  }
  0x79   :  { %v32_v3 = vpop.permute.xlu0 %31 }
  0x7a   :  { %v36_v6 = vsub.f32 %v26_v4, %v32_v3  ;;  %v37_v7 = vsub.f32 %v27_v5, %v32_v3  ;;  %vm34_vm0 = vcmp.gt.f32.partialorder %v26_v4, %v32_v3  ;;  %vm35_vm1 = vcmp.gt.f32.partialorder %v27_v5, %v32_v3 }
  0x7b   :  { %v48_v9 = vadd.f32 %v32_v3, %v26_v4  ;;  %v49_v10 = vadd.f32 %v32_v3, %v27_v5 }
  0x7c   :  { %v38_v11 = vsel %vm34_vm0, %v36_v6, 0.0  ;;  %v39_v12 = vsel %vm35_vm1, %v37_v7, 0.0 }
  0x81   :  { %v44_v8 = vpop.permute.xlu0 %43 }
  0x82   :  { %vm46_vm2 = vcmp.lt.f32.partialorder %v26_v4, %v44_v8  ;;  %vm47_vm3 = vcmp.lt.f32.partialorder %v27_v5, %v44_v8 }
  0x83   :  { %v50_v13 = vsel %vm46_vm2, %v48_v9, 0.0  ;;  %v51_v14 = vsel %vm47_vm3, %v49_v10, 0.0 }
  0x84   :  { %v52_v15 = vadd.f32 %v50_v13, %v38_v11  ;;  %v53_v16 = vadd.f32 %v51_v14, %v39_v12 }
  0x86   :  { %54 = vst [vmem:[#allocation5] sm:$0xff] %v52_v15 }
  0x87   :  { %55 = vst [vmem:[#allocation5 + $0x8] sm:$0xff] %v53_v16 }
  0x88   :  { %66 = dma.vmem_to_hbm [thread:$0]  %s62_s16, 256, %s64_s1, [#allocation4]  }
  0x89   :  { %127 = dma.done.wait [#allocation4], 256  }
  0x8a   :  { %128 = vsyncadd [#allocation4], 4294967040 }
  0x8b   :  { %71 = vsyncpa [#allocation3], 1 }
  0x8c   :  { %72 = vsyncpa [#allocation4], 1 }

</bundles_post_ra>
